<compile_context>
chip_gen: v7x
topology: tpu7x:2x2x1
jax: 0.10.0
libtpu: 0.0.40
codegen_flags: <defaults>
</compile_context>

<pallas_src>
import jax
import jax.numpy as jnp
from jax import lax
from jax.experimental import pallas as pl
from jax.experimental.pallas import tpu as pltpu


_WEIGHT_RESIDENT_BYTES = 6 * 1024 * 1024   # keep W fully VMEM-resident below this


# ----------------------------------------------------------------------------
# Fast path: n_features == 1 and n_outputs == 1   (y = x * w + b)
# ----------------------------------------------------------------------------
def _linear_fma_kernel(w_ref, b_ref, x_ref, o_ref):
    # w_ref / b_ref are (1, 1) scalars in SMEM; x_ref / o_ref are sublane+lane
    # dense (tr, L) VMEM tiles.  One VPU FMA per vreg, no MXU on the path.
    o_ref[...] = x_ref[...] * w_ref[0, 0] + b_ref[0, 0]


def _linear_forward_1x1(x, weight, bias):
    B = x.shape[0]

    # Present the batch as a 2-D sublane+lane dense slab (rows, L) so each
    # vreg packs 8x128 useful elements and stores are wide unmasked vst.
    L = 128
    for cand in (1024, 512, 256, 128):
        if B % cand == 0:
            L = cand
            break
    Bp = ((B + L - 1) // L) * L            # pad ragged batches to a lane row
    rows = Bp // L

    xf = x.reshape(-1)
    if Bp != B:
        xf = jnp.pad(xf, (0, Bp - B))
    x2 = xf.reshape(rows, L)

    # ~2 MiB per streamed buffer (measured ~85% of HBM roofline at >=512-wide
    # tiles vs ~29% at 128); double-buffered in+out stays well under VMEM.
    tr_target = max(8, ((2 * 1024 * 1024 // (L * 4)) // 8) * 8)
    tr = rows if rows <= tr_target else tr_target
    grid = (pl.cdiv(rows, tr),)

    w11 = weight.reshape(1, 1)
    b11 = bias.reshape(1, 1)

    out = pl.pallas_call(
        _linear_fma_kernel,
        out_shape=jax.ShapeDtypeStruct((rows, L), x.dtype),
        grid_spec=pltpu.PrefetchScalarGridSpec(
            num_scalar_prefetch=0,
            grid=grid,
            in_specs=[
                pl.BlockSpec((1, 1), lambda i: (0, 0),
                             memory_space=pltpu.MemorySpace.SMEM),
                pl.BlockSpec((1, 1), lambda i: (0, 0),
                             memory_space=pltpu.MemorySpace.SMEM),
                pl.BlockSpec((tr, L), lambda i: (i, 0)),
            ],
            out_specs=pl.BlockSpec((tr, L), lambda i: (i, 0)),
        ),
        compiler_params=pltpu.CompilerParams(
            dimension_semantics=("parallel",),
        ),
        cost_estimate=pl.CostEstimate(
            flops=2 * Bp, transcendentals=0, bytes_accessed=8 * Bp + 8),
    )(w11, b11, x2)
    return out.reshape(Bp)[:B].reshape(B, 1)


# ----------------------------------------------------------------------------
# Weight-resident general path: W and bias DMA'd once, only x / y stream
# ----------------------------------------------------------------------------
def _linear_wres_kernel(x_ref, w_ref, b_ref, o_ref):
    # Weight stays in its PyTorch (O, F) layout; contract both operands on F
    # (Mosaic lowers the transposed-RHS contraction natively on the MXU).
    acc = lax.dot_general(
        x_ref[...], w_ref[...],
        dimension_numbers=(((1,), (1,)), ((), ())),
        preferred_element_type=jnp.float32,
    )
    o_ref[...] = (acc + b_ref[...].astype(jnp.float32)).astype(o_ref.dtype)


def _linear_forward_weight_resident(x, weight, bias):
    B, F = x.shape
    O = weight.shape[0]
    b2d = bias.reshape(1, O)

    # M tile: ~2 MiB of streamed (x row + out row) bytes per step, and at
    # least two grid steps when B allows it so v7x's two TensorCores both
    # get parallel work.
    row_bytes = (F + O) * 4
    budget = max(8, ((2 * 1024 * 1024 // row_bytes) // 8) * 8)
    tm = min(B, budget, 1024)
    if B >= 16:
        half = (((B + 1) // 2 + 7) // 8) * 8
        tm = min(tm, half)
    if tm != B:
        tm = max(8, (tm // 8) * 8)

    grid = (pl.cdiv(B, tm),)

    return pl.pallas_call(
        _linear_wres_kernel,
        out_shape=jax.ShapeDtypeStruct((B, O), x.dtype),
        grid_spec=pltpu.PrefetchScalarGridSpec(
            num_scalar_prefetch=0,
            grid=grid,
            in_specs=[
                pl.BlockSpec((tm, F), lambda i: (i, 0)),   # x: streamed
                pl.BlockSpec((O, F), lambda i: (0, 0)),    # W: resident (index fixed)
                pl.BlockSpec((1, O), lambda i: (0, 0)),    # bias: resident
            ],
            out_specs=pl.BlockSpec((tm, O), lambda i: (i, 0)),
        ),
        compiler_params=pltpu.CompilerParams(
            dimension_semantics=("parallel",),
        ),
        cost_estimate=pl.CostEstimate(
            flops=2 * B * F * O,
            transcendentals=0,
            bytes_accessed=4 * (B * F + O * F + O + B * O)),
    )(x, weight, b2d)


# ----------------------------------------------------------------------------
# Large general path: tiled matmul with f32 VMEM accumulator
# ----------------------------------------------------------------------------
def _linear_tiled_kernel(x_ref, w_ref, b_ref, o_ref, acc_ref):
    k = pl.program_id(2)

    @pl.when(k == 0)
    def _():
        acc_ref[...] = jnp.zeros_like(acc_ref)

    # (O, F)-layout weight contracted on its F axis: no wrapper-side weight.T
    # copy is ever materialized.
    acc_ref[...] += lax.dot_general(
        x_ref[...], w_ref[...],
        dimension_numbers=(((1,), (1,)), ((), ())),
        preferred_element_type=jnp.float32,
    )

    @pl.when(k == pl.num_programs(2) - 1)
    def _():
        o_ref[...] = (acc_ref[...] + b_ref[...].astype(jnp.float32)
                      ).astype(o_ref.dtype)


def _pick_mn_tile(dim, target, align):
    # Full axis if it is small, otherwise an `align`-multiple tile.
    if dim <= target:
        return dim
    return max((target // align) * align, align)


def _pick_k_tile(dim, target=1024):
    # The K tile must equal F or divide it exactly so padded partial blocks
    # never leak into the accumulation.
    if dim <= target:
        return dim
    for cand in (1024, 512, 256, 128):
        if dim % cand == 0:
            return cand
    return None   # caller zero-pads the contraction axis


def _linear_forward_tiled(x, weight, bias, *, tiles=None):
    B, F = x.shape
    O = weight.shape[0]

    if tiles is not None:
        tm, tn, tk = tiles
    else:
        tm = _pick_mn_tile(B, 512, 8)      # second-minor axis: x8 aligned (or full)
        tn = _pick_mn_tile(O, 512, 256)    # 256-aligned for v6e/v7x 2x256x256 MXU
        tk = _pick_k_tile(F, 1024)
        if tk is None:
            # Bounded K tile even for awkward large F: zero-pad the contraction
            # axis (zeros contribute nothing), keeping the x / W tiles small
            # enough for v7x's 64 MiB VMEM and the k-loop pipelined.
            Fp = ((F + 511) // 512) * 512
            x = jnp.pad(x, ((0, 0), (0, Fp - F)))
            weight = jnp.pad(weight, ((0, 0), (0, Fp - F)))
            F = Fp
            tk = 512
        if B >= 16 and pl.cdiv(B, tm) * pl.cdiv(O, tn) < 2:
            # v7x: make sure both TensorCores get at least one parallel step.
            tm = min(tm, (((B + 1) // 2 + 7) // 8) * 8)

    b2d = bias.reshape(1, O)
    grid = (pl.cdiv(B, tm), pl.cdiv(O, tn), pl.cdiv(F, tk))

    return pl.pallas_call(
        _linear_tiled_kernel,
        out_shape=jax.ShapeDtypeStruct((B, O), x.dtype),
        grid_spec=pltpu.PrefetchScalarGridSpec(
            num_scalar_prefetch=0,
            grid=grid,
            in_specs=[
                pl.BlockSpec((tm, tk), lambda i, j, k: (i, k)),   # x (B, F)
                pl.BlockSpec((tn, tk), lambda i, j, k: (j, k)),   # W (O, F)
                pl.BlockSpec((1, tn), lambda i, j, k: (0, j)),    # bias (1, O)
            ],
            out_specs=pl.BlockSpec((tm, tn), lambda i, j, k: (i, j)),
            scratch_shapes=[pltpu.VMEM((tm, tn), jnp.float32)],
        ),
        compiler_params=pltpu.CompilerParams(
            dimension_semantics=("parallel", "parallel", "arbitrary"),
            vmem_limit_bytes=32 * 1024 * 1024,
        ),
        cost_estimate=pl.CostEstimate(
            flops=2 * B * F * O,
            transcendentals=0,
            bytes_accessed=4 * (B * F + O * F + O + B * O)),
    )(x, weight, b2d)


# ----------------------------------------------------------------------------
# Dispatch
# ----------------------------------------------------------------------------
def linear_net_forward(x, weight, bias):
    """Forward of linear_net (nn.Linear): y = x @ weight.T + bias.

    x: (B, F) f32, weight: (O, F) f32 (PyTorch nn.Linear layout), bias: (O,).
    """
    B, F = x.shape
    O = weight.shape[0]
    if F == 1 and O == 1:
        return _linear_forward_1x1(x, weight, bias)
    # TODO(synk): a dedicated VPU multiply+reduce path for O == 1 / O < 128
    # (matrix-vector) would avoid narrow masked output stores; currently
    # routed through the MXU paths below.
    # TODO(synk): optional bf16 cast of x/W tiles (f32 accumulation) would
    # roughly halve HBM traffic and 2-4x MXU rate, but changes numerics.
    if weight.shape[0] * weight.shape[1] * weight.dtype.itemsize <= _WEIGHT_RESIDENT_BYTES:
        return _linear_forward_weight_resident(x, weight, bias)
    return _linear_forward_tiled(x, weight, bias)


if __name__ == "__main__":
    key = jax.random.PRNGKey(0)
    ks = jax.random.split(key, 10)

    # --- Case 1: module defaults nn.Linear(1, 1), tiny batch (pad path).
    B1 = 8
    x1 = jax.random.normal(ks[0], (B1, 1), dtype=jnp.float32)
    w1 = jax.random.normal(ks[1], (1, 1), dtype=jnp.float32) * 0.1
    b1 = jax.random.normal(ks[2], (1,), dtype=jnp.float32) * 0.1
    out1 = jax.block_until_ready(linear_net_forward(x1, w1, b1))
    ref1 = x1 @ w1.T + b1
    assert out1.shape == (B1, 1)
    assert jnp.allclose(out1, ref1, atol=1e-5, rtol=1e-5)

    # --- Case 1b: 1x1 path on a lane/sublane-dense slab (B multiple of 1024).
    B1b = 2048
    x1b = jax.random.normal(ks[3], (B1b, 1), dtype=jnp.float32)
    out1b = jax.block_until_ready(linear_net_forward(x1b, w1, b1))
    ref1b = x1b @ w1.T + b1
    assert out1b.shape == (B1b, 1)
    assert jnp.allclose(out1b, ref1b, atol=1e-5, rtol=1e-5)

    # --- Case 2: small general layer -> weight-resident path (2 M tiles).
    B2, F2, O2 = 16, 32, 8
    x2 = jax.random.normal(ks[4], (B2, F2), dtype=jnp.float32)
    w2 = jax.random.normal(ks[5], (O2, F2), dtype=jnp.float32) * 0.1
    b2 = jax.random.normal(ks[6], (O2,), dtype=jnp.float32) * 0.1
    out2 = jax.block_until_ready(linear_net_forward(x2, w2, b2))
    ref2 = x2 @ w2.T + b2
    assert out2.shape == (B2, O2)
    assert jnp.allclose(out2, ref2, atol=1e-4, rtol=1e-4)

    # --- Case 3: exercise the tiled K-accumulating kernel at small shapes by
    # forcing small tiles (partial M block, 2x2x2 grid).
    B3, F3, O3 = 24, 256, 256
    x3 = jax.random.normal(ks[7], (B3, F3), dtype=jnp.float32)
    w3 = jax.random.normal(ks[8], (O3, F3), dtype=jnp.float32) * 0.05
    b3 = jax.random.normal(ks[9], (O3,), dtype=jnp.float32) * 0.05
    out3 = jax.block_until_ready(
        _linear_forward_tiled(x3, w3, b3, tiles=(16, 128, 128)))
    ref3 = x3 @ w3.T + b3
    assert out3.shape == (B3, O3)
    assert jnp.allclose(out3, ref3, atol=1e-3, rtol=1e-3)

    print("KERNEL_OK")
</pallas_src>

<mosaic_0001>
module attributes {stable_mosaic.version = 11 : i64} {
  func.func @_linear_fma_kernel(%arg0: i32, %arg1: memref<1x1xf32, #tpu.memory_space<smem>>, %arg2: memref<1x1xf32, #tpu.memory_space<smem>>, %arg3: memref<1x128xf32, #tpu.memory_space<vmem>>, %arg4: memref<1x128xf32, #tpu.memory_space<vmem>>) attributes {dimension_semantics = [#tpu.dimension_semantics<parallel>], iteration_bounds = array<i64: 1>, scalar_prefetch = 0 : i64, scratch_operands = 0 : i64, tpu.core_type = #tpu.core_type<tc>, window_params = [{transform_indices = @transform_0, window_bounds = array<i64: 1, 1>}, {transform_indices = @transform_1, window_bounds = array<i64: 1, 1>}, {transform_indices = @transform_2, window_bounds = array<i64: 1, 128>}, {transform_indices = @transform_3, window_bounds = array<i64: 1, 128>}]} {
    %c0 = arith.constant 0 : index
    %c0_0 = arith.constant 0 : index
    %0 = vector.load %arg3[%c0, %c0_0] : memref<1x128xf32, #tpu.memory_space<vmem>>, vector<1x128xf32>
    %c0_1 = arith.constant 0 : index
    %c0_2 = arith.constant 0 : index
    %1 = memref.load %arg1[%c0_1, %c0_2] : memref<1x1xf32, #tpu.memory_space<smem>>
    %2 = vector.broadcast %1 : f32 to vector<1x128xf32>
    %3 = arith.mulf %0, %2 : vector<1x128xf32>
    %c0_3 = arith.constant 0 : index
    %c0_4 = arith.constant 0 : index
    %4 = memref.load %arg2[%c0_3, %c0_4] : memref<1x1xf32, #tpu.memory_space<smem>>
    %5 = vector.broadcast %4 : f32 to vector<1x128xf32>
    %6 = arith.addf %3, %5 : vector<1x128xf32>
    %c0_5 = arith.constant 0 : index
    %c0_6 = arith.constant 0 : index
    %7 = vector.load %arg4[%c0_5, %c0_6] : memref<1x128xf32, #tpu.memory_space<vmem>>, vector<1x128xf32>
    tpu.vector_store %arg4[%c0_5, %c0_6], %6 {strides = array<i32>} : memref<1x128xf32, #tpu.memory_space<vmem>>, vector<1x128xf32>,
    return
  }
  func.func @transform_0(%arg0: i32) -> (i32, i32) {
    %c0_i32 = arith.constant 0 : i32
    %c0_i32_0 = arith.constant 0 : i32
    %c0_i32_1 = arith.constant 0 : i32
    return %c0_i32, %c0_i32_0 : i32, i32
  }
  func.func @transform_1(%arg0: i32) -> (i32, i32) {
    %c0_i32 = arith.constant 0 : i32
    %c0_i32_0 = arith.constant 0 : i32
    %c0_i32_1 = arith.constant 0 : i32
    return %c0_i32, %c0_i32_0 : i32, i32
  }
  func.func @transform_2(%arg0: i32) -> (i32, i32) {
    %c0_i32 = arith.constant 0 : i32
    %c0_i32_0 = arith.constant 0 : i32
    return %arg0, %c0_i32 : i32, i32
  }
  func.func @transform_3(%arg0: i32) -> (i32, i32) {
    %c0_i32 = arith.constant 0 : i32
    %c0_i32_0 = arith.constant 0 : i32
    return %arg0, %c0_i32 : i32, i32
  }
}

</mosaic_0001>

<bundles_post_ra>
// kernel: tpu_custom_call.1
= control target key start
LH: loop header
LB: loop body
LE: loop exit
PB: predicated region body
PF: predicated region fallthrough
CT: control target
= control target key end

     0   :  { %s106_s0 = inlined_call_operand.<no memory space> [shape: f32[1,1], index: 0, kind: input, shape index: {}]   ;;  %s107_s1 = inlined_call_operand.<no memory space> [shape: f32[1,1], index: 1, kind: input, shape index: {}]   ;;  %s108_s2 = inlined_call_operand.vmem [shape: f32[1,128], index: 2, kind: input, shape index: {}]   ;;  %s109_s3 = inlined_call_operand.hbm [shape: f32[1,128], index: 3, kind: output, shape index: {}]  }
   0x1   :  { %v17_v0 = vld [vmem:[%s108_s2] sm:$0x1]  ;;  %v19_v1 = vstv %s106_s0  ;;  %v22_v2 = vstv %s107_s1 }
   0x2   :  { %10 = vsyncpa [#allocation5], 0  ;;  %v20_v3 = vmul.f32 %v19_v1, %v17_v0  ;;  %s64_s18 = smov [#allocation4]  }
   0x3   :  { %s31_s19 = sshll.u32 %s64_s18, 4  ;;  %s32_s19 = int_to_ptr.vmem [resolvable:$true] %s31_s19 }
   0x4   :  { %v23_v4 = vadd.f32 %v22_v2, %v20_v3  ;;  %s40_s20 = scalar_lea.vmem %s32_s19, 16  ;;  %s44_s21 = scalar_lea.vmem %s32_s19, 32 }
   0x5   :  { %p41_p0 = scmp.ne.s32.totalorder %s32_s19, %s40_s20  ;;  %p45_p1 = scmp.lt.s32.totalorder %s32_s19, %s32_s19 }
   0x6   :  { %24 = vst [vmem:[#allocation4] sm:$0x1] %v23_v4  ;;  %p46_p2 = scmp.lt.s32.totalorder %s44_s21, %s40_s20 }
   0x8   :  { %p47_p3 = por %p46_p2, %p45_p1 }
   0xa   :  { %p48_p4 = pnand %p47_p3, %p41_p0 }
   0xc   :  { %51 = shalt.err (!%p48_p4)
}
   0xd   :  { %s52_s22 = scalar_lea.hbm %s109_s3, 16 }
   0xe   :  { %p53_p5 = scmp.ne.s32.totalorder %s109_s3, %s52_s22  ;;  %p56_p6 = scmp.lt.u32.totalorder %s52_s22, %s109_s3 }
  0x10   :  { %p58_p7 = pnand %p56_p6, %p53_p5 }
  0x12   :  { %61 = shalt.err (!%p58_p7)
}
  0x13   :  { %34 = dma.vmem_to_hbm [thread:$0]  %s32_s19, 16, %s109_s3, [#allocation5]  }
  0x14   :  { %62 = dma.done.wait [#allocation5], 16  }
  0x15   :  { %63 = vsyncadd [#allocation5], 4294967280 }
  0x16   :  { %38 = vsyncpa [#allocation5], 1 }

</bundles_post_ra>
